<compile_context>
chip_gen: v7x
topology: tpu7x:2x2x1
jax: 0.10.0
libtpu: 0.0.40
codegen_flags: <defaults>
</compile_context>

<pallas_src>
import math
import jax
import jax.numpy as jnp
from jax.experimental import pallas as pl
from jax.experimental.pallas import tpu as pltpu

OUT_LANES = 128  # lane-dense output width (final result lives in column 0)


def mlp_kernel(x_ref, w1_ref, b1_ref, w2_ref, b2_ref, w3_ref, b3_ref, o_ref):
    # x_ref:  (TM, size)      bf16 (or f32)
    # w1_ref: (size, 64) bf16, w2_ref: (64, 32) bf16, w3_ref: (32, 128) bf16 (col 0 real)
    # b1/b2/b3: f32 (1, 64) / (1, 32) / (1, 128)
    # o_ref:  (TM, 128) f32   -- lane-dense store; only column 0 is meaningful.
    x = x_ref[...]
    h1 = jnp.dot(x, w1_ref[...], preferred_element_type=jnp.float32) + b1_ref[...]
    h1 = jnp.maximum(h1, 0.0)  # ReLU + bias in f32 (v5e VPU has no bf16 path)
    h2 = jnp.dot(h1.astype(w2_ref.dtype), w2_ref[...],
                 preferred_element_type=jnp.float32) + b2_ref[...]
    h2 = jnp.maximum(h2, 0.0)
    o_ref[...] = jnp.dot(h2.astype(w3_ref.dtype), w3_ref[...],
                         preferred_element_type=jnp.float32) + b3_ref[...]


def _round_up(x, m):
    return ((x + m - 1) // m) * m


def neural_network_forward(x_nchw, params, *, block_rows=512,
                           compute_dtype=jnp.bfloat16):
    """Pallas equivalent of NeuralNetwork.forward. x_nchw: (N, C, H, W) float32.

    block_rows: rows of x per grid step. 512 saturates the HBM roofline and a
    bf16 (512, size) block is ~1 MiB (double-buffered 2 MiB), which fits every
    generation including v7x's 64 MiB VMEM with large headroom.
    """
    w1, b1, w2, b2, w3, b3 = params
    n = x_nchw.shape[0]
    size = math.prod(x_nchw.shape[1:])
    x2d = x_nchw.reshape(n, size).astype(compute_dtype)  # nn.Flatten semantics

    # Pad the final layer to a lane-dense 128-wide output (column 0 is real).
    w3p = jnp.zeros((w3.shape[0], OUT_LANES), w3.dtype).at[:, :1].set(w3)
    b3p = jnp.zeros((1, OUT_LANES), b3.dtype).at[:, :1].set(b3)

    w1c = w1.astype(compute_dtype)
    w2c = w2.astype(compute_dtype)
    w3c = w3p.astype(compute_dtype)
    b1c = b1.astype(jnp.float32)
    b2c = b2.astype(jnp.float32)
    b3c = b3p.astype(jnp.float32)

    # Tile the batch; keep TM a multiple of 8 sublanes and pad N to a multiple
    # of TM so the tail block is well-formed (padded rows are sliced off below).
    tm = min(_round_up(block_rows, 8), _round_up(n, 8))
    n_pad = _round_up(n, tm)
    if n_pad != n:
        x2d = jnp.pad(x2d, ((0, n_pad - n), (0, 0)))

    grid = (n_pad // tm,)
    out = pl.pallas_call(
        mlp_kernel,
        out_shape=jax.ShapeDtypeStruct((n_pad, OUT_LANES), jnp.float32),
        grid_spec=pltpu.PrefetchScalarGridSpec(
            num_scalar_prefetch=0,
            grid=grid,
            in_specs=[
                pl.BlockSpec((tm, size), lambda i: (i, 0)),        # stream x
                pl.BlockSpec((size, 64), lambda i: (0, 0)),        # w1 pinned
                pl.BlockSpec((1, 64), lambda i: (0, 0)),           # b1 pinned
                pl.BlockSpec((64, 32), lambda i: (0, 0)),          # w2 pinned
                pl.BlockSpec((1, 32), lambda i: (0, 0)),           # b2 pinned
                pl.BlockSpec((32, OUT_LANES), lambda i: (0, 0)),   # w3 pinned
                pl.BlockSpec((1, OUT_LANES), lambda i: (0, 0)),    # b3 pinned
            ],
            out_specs=pl.BlockSpec((tm, OUT_LANES), lambda i: (i, 0)),
        ),
        compiler_params=pltpu.CompilerParams(
            dimension_semantics=("parallel",),        # shard batch across TCs (v7x)
            vmem_limit_bytes=32 * 1024 * 1024,        # explicit, safe on v5e/v6e/v7x
        ),
    )(x2d, w1c, b1c, w2c, b2c, w3c, b3c)

    return out[:n, :1]


def init_params(key, size):
    """Deterministic init mirroring torch.nn.Linear default (U(-1/sqrt(fan_in), +))."""
    dims = [(size, 64), (64, 32), (32, 1)]
    params = []
    for fan_in, fan_out in dims:
        kw, kb, key = jax.random.split(key, 3)
        bound = 1.0 / math.sqrt(fan_in)
        w = jax.random.uniform(kw, (fan_in, fan_out), jnp.float32, -bound, bound)
        b = jax.random.uniform(kb, (1, fan_out), jnp.float32, -bound, bound)
        params.extend([w, b])
    return tuple(params)


def reference_forward(x_nchw, params):
    w1, b1, w2, b2, w3, b3 = params
    x = x_nchw.reshape(x_nchw.shape[0], -1)
    h1 = jnp.maximum(x @ w1 + b1, 0.0)
    h2 = jnp.maximum(h1 @ w2 + b2, 0.0)
    return h2 @ w3 + b3


if __name__ == "__main__":
    key = jax.random.PRNGKey(0)
    kx, kp = jax.random.split(key)

    N, C, H, W = 2, 4, 16, 16
    size = C * H * W  # 1024

    x = jax.random.normal(kx, (N, C, H, W), jnp.float32)
    params = init_params(kp, size)

    out = neural_network_forward(x, params)
    out = jax.block_until_ready(out)

    ref = reference_forward(x, params)
    assert out.shape == (N, 1), out.shape
    # bf16 inputs/weights (f32 accumulation) => allow ~1e-2-level divergence.
    assert jnp.allclose(out, ref, atol=5e-2, rtol=5e-2), "mismatch vs reference"

    print("KERNEL_OK")
</pallas_src>

<mosaic_0001>
module attributes {stable_mosaic.version = 11 : i64} {
  func.func @mlp_kernel(%arg0: i32, %arg1: memref<8x1024xbf16, #tpu.memory_space<vmem>>, %arg2: memref<1024x64xbf16, #tpu.memory_space<vmem>>, %arg3: memref<1x64xf32, #tpu.memory_space<vmem>>, %arg4: memref<64x32xbf16, #tpu.memory_space<vmem>>, %arg5: memref<1x32xf32, #tpu.memory_space<vmem>>, %arg6: memref<32x128xbf16, #tpu.memory_space<vmem>>, %arg7: memref<1x128xf32, #tpu.memory_space<vmem>>, %arg8: memref<8x128xf32, #tpu.memory_space<vmem>>) attributes {dimension_semantics = [#tpu.dimension_semantics<parallel>], iteration_bounds = array<i64: 1>, scalar_prefetch = 0 : i64, scratch_operands = 0 : i64, tpu.core_type = #tpu.core_type<tc>, window_params = [{transform_indices = @transform_0, window_bounds = array<i64: 8, 1024>}, {pipeline_mode = #tpu.pipeline_mode<synchronous>, transform_indices = @transform_1, window_bounds = array<i64: 1024, 64>}, {pipeline_mode = #tpu.pipeline_mode<synchronous>, transform_indices = @transform_2, window_bounds = array<i64: 1, 64>}, {pipeline_mode = #tpu.pipeline_mode<synchronous>, transform_indices = @transform_3, window_bounds = array<i64: 64, 32>}, {pipeline_mode = #tpu.pipeline_mode<synchronous>, transform_indices = @transform_4, window_bounds = array<i64: 1, 32>}, {pipeline_mode = #tpu.pipeline_mode<synchronous>, transform_indices = @transform_5, window_bounds = array<i64: 32, 128>}, {pipeline_mode = #tpu.pipeline_mode<synchronous>, transform_indices = @transform_6, window_bounds = array<i64: 1, 128>}, {transform_indices = @transform_7, window_bounds = array<i64: 8, 128>}]} {
    %c0 = arith.constant 0 : index
    %c0_0 = arith.constant 0 : index
    %0 = vector.load %arg1[%c0, %c0_0] : memref<8x1024xbf16, #tpu.memory_space<vmem>>, vector<8x1024xbf16>
    %c0_1 = arith.constant 0 : index
    %c0_2 = arith.constant 0 : index
    %1 = vector.load %arg2[%c0_1, %c0_2] : memref<1024x64xbf16, #tpu.memory_space<vmem>>, vector<1024x64xbf16>
    %cst = arith.constant dense<0.000000e+00> : vector<8x64xf32>
    %2 = tpu.matmul %0, %1, %cst {dimension_numbers = #tpu.dot_dimension_numbers<[1], [0], [0], [1], [0, 0, 1, 1], [], []>} : vector<8x1024xbf16>, vector<1024x64xbf16>, vector<8x64xf32> -> vector<8x64xf32>
    %c0_3 = arith.constant 0 : index
    %c0_4 = arith.constant 0 : index
    %3 = vector.load %arg3[%c0_3, %c0_4] : memref<1x64xf32, #tpu.memory_space<vmem>>, vector<1x64xf32>
    %4 = vector.broadcast %3 : vector<1x64xf32> to vector<8x64xf32>
    %5 = arith.addf %2, %4 : vector<8x64xf32>
    %cst_5 = arith.constant 0.000000e+00 : f32
    %6 = vector.broadcast %cst_5 : f32 to vector<8x64xf32>
    %7 = arith.maximumf %5, %6 : vector<8x64xf32>
    %8 = arith.truncf %7 : vector<8x64xf32> to vector<8x64xbf16>
    %c0_6 = arith.constant 0 : index
    %c0_7 = arith.constant 0 : index
    %9 = vector.load %arg4[%c0_6, %c0_7] : memref<64x32xbf16, #tpu.memory_space<vmem>>, vector<64x32xbf16>
    %cst_8 = arith.constant dense<0.000000e+00> : vector<8x32xf32>
    %10 = tpu.matmul %8, %9, %cst_8 {dimension_numbers = #tpu.dot_dimension_numbers<[1], [0], [0], [1], [0, 0, 1, 1], [], []>} : vector<8x64xbf16>, vector<64x32xbf16>, vector<8x32xf32> -> vector<8x32xf32>
    %c0_9 = arith.constant 0 : index
    %c0_10 = arith.constant 0 : index
    %11 = vector.load %arg5[%c0_9, %c0_10] : memref<1x32xf32, #tpu.memory_space<vmem>>, vector<1x32xf32>
    %12 = vector.broadcast %11 : vector<1x32xf32> to vector<8x32xf32>
    %13 = arith.addf %10, %12 : vector<8x32xf32>
    %cst_11 = arith.constant 0.000000e+00 : f32
    %14 = vector.broadcast %cst_11 : f32 to vector<8x32xf32>
    %15 = arith.maximumf %13, %14 : vector<8x32xf32>
    %16 = arith.truncf %15 : vector<8x32xf32> to vector<8x32xbf16>
    %c0_12 = arith.constant 0 : index
    %c0_13 = arith.constant 0 : index
    %17 = vector.load %arg6[%c0_12, %c0_13] : memref<32x128xbf16, #tpu.memory_space<vmem>>, vector<32x128xbf16>
    %cst_14 = arith.constant dense<0.000000e+00> : vector<8x128xf32>
    %18 = tpu.matmul %16, %17, %cst_14 {dimension_numbers = #tpu.dot_dimension_numbers<[1], [0], [0], [1], [0, 0, 1, 1], [], []>} : vector<8x32xbf16>, vector<32x128xbf16>, vector<8x128xf32> -> vector<8x128xf32>
    %c0_15 = arith.constant 0 : index
    %c0_16 = arith.constant 0 : index
    %19 = vector.load %arg7[%c0_15, %c0_16] : memref<1x128xf32, #tpu.memory_space<vmem>>, vector<1x128xf32>
    %20 = vector.broadcast %19 : vector<1x128xf32> to vector<8x128xf32>
    %21 = arith.addf %18, %20 : vector<8x128xf32>
    %c0_17 = arith.constant 0 : index
    %c0_18 = arith.constant 0 : index
    %22 = vector.load %arg8[%c0_17, %c0_18] : memref<8x128xf32, #tpu.memory_space<vmem>>, vector<8x128xf32>
    tpu.vector_store %arg8[%c0_17, %c0_18], %21 {strides = array<i32>} : memref<8x128xf32, #tpu.memory_space<vmem>>, vector<8x128xf32>,
    return
  }
  func.func @transform_0(%arg0: i32) -> (i32, i32) {
    %c0_i32 = arith.constant 0 : i32
    %c0_i32_0 = arith.constant 0 : i32
    return %arg0, %c0_i32 : i32, i32
  }
  func.func @transform_1(%arg0: i32) -> (i32, i32) {
    %c0_i32 = arith.constant 0 : i32
    %c0_i32_0 = arith.constant 0 : i32
    %c0_i32_1 = arith.constant 0 : i32
    return %c0_i32, %c0_i32_0 : i32, i32
  }
  func.func @transform_2(%arg0: i32) -> (i32, i32) {
    %c0_i32 = arith.constant 0 : i32
    %c0_i32_0 = arith.constant 0 : i32
    %c0_i32_1 = arith.constant 0 : i32
    return %c0_i32, %c0_i32_0 : i32, i32
  }
  func.func @transform_3(%arg0: i32) -> (i32, i32) {
    %c0_i32 = arith.constant 0 : i32
    %c0_i32_0 = arith.constant 0 : i32
    %c0_i32_1 = arith.constant 0 : i32
    return %c0_i32, %c0_i32_0 : i32, i32
  }
  func.func @transform_4(%arg0: i32) -> (i32, i32) {
    %c0_i32 = arith.constant 0 : i32
    %c0_i32_0 = arith.constant 0 : i32
    %c0_i32_1 = arith.constant 0 : i32
    return %c0_i32, %c0_i32_0 : i32, i32
  }
  func.func @transform_5(%arg0: i32) -> (i32, i32) {
    %c0_i32 = arith.constant 0 : i32
    %c0_i32_0 = arith.constant 0 : i32
    %c0_i32_1 = arith.constant 0 : i32
    return %c0_i32, %c0_i32_0 : i32, i32
  }
  func.func @transform_6(%arg0: i32) -> (i32, i32) {
    %c0_i32 = arith.constant 0 : i32
    %c0_i32_0 = arith.constant 0 : i32
    %c0_i32_1 = arith.constant 0 : i32
    return %c0_i32, %c0_i32_0 : i32, i32
  }
  func.func @transform_7(%arg0: i32) -> (i32, i32) {
    %c0_i32 = arith.constant 0 : i32
    %c0_i32_0 = arith.constant 0 : i32
    return %arg0, %c0_i32 : i32, i32
  }
}

</mosaic_0001>

<bundles_post_ra>
// kernel: tpu_custom_call.1
= control target key start
LH: loop header
LB: loop body
LE: loop exit
PB: predicated region body
PF: predicated region fallthrough
CT: control target
= control target key end

     0   :  { %s1498_s0 = inlined_call_operand.vmem [shape: bf16[8,1024], index: 0, kind: input, shape index: {}]   ;;  %s1499_s1 = inlined_call_operand.vmem [shape: bf16[1024,64], index: 1, kind: input, shape index: {}]   ;;  %s1500_s2 = inlined_call_operand.vmem [shape: f32[1,64], index: 2, kind: input, shape index: {}]   ;;  %s1501_s3 = inlined_call_operand.vmem [shape: bf16[64,32], index: 3, kind: input, shape index: {}]   ;;  %s1502_s4 = inlined_call_operand.vmem [shape: f32[1,32], index: 4, kind: input, shape index: {}]   ;;  %s1503_s5 = inlined_call_operand.vmem [shape: bf16[32,128], index: 5, kind: input, shape index: {}]   ;;  %s1504_s6 = inlined_call_operand.vmem [shape: f32[1,128], index: 6, kind: input, shape index: {}]   ;;  %s1505_s7 = inlined_call_operand.hbm [shape: f32[8,128], index: 7, kind: output, shape index: {}]  }
   0x1   :  { %v1110_v0 = vld [vmem:[%s1499_s1 + $0x40] sm:$0xff]   ;;  %v1114_v4 = vld [vmem:[%s1499_s1 + $0x48] sm:$0xff]   ;;  %v1118_v8 = vld [vmem:[%s1499_s1 + $0x50] sm:$0xff]  }
   0x2   :  { %v1111_v1 = vld [vmem:[%s1499_s1 + $0xc0] sm:$0xff]   ;;  %991 = vmatprep.subr.bf16.mxu0 %v1110_v0  ;;  %v1115_v5 = vld [vmem:[%s1499_s1 + $0xc8] sm:$0xff]   ;;  %v1119_v9 = vld [vmem:[%s1499_s1 + $0xd0] sm:$0xff]  }
   0x3   :  { %v1112_v2 = vld [vmem:[%s1499_s1] sm:$0xff]   ;;  %1013 = vmatprep.subr.bf16.mxu1 %v1111_v1  ;;  %v1116_v6 = vld [vmem:[%s1499_s1 + $0x8] sm:$0xff]   ;;  %v1120_v10 = vld [vmem:[%s1499_s1 + $0x10] sm:$0xff]  }
   0x4   :  { %v1113_v3 = vld [vmem:[%s1499_s1 + $0x80] sm:$0xff]   ;;  %992 = vmatpush3.bf16.msra.mxu0 %v1112_v2  ;;  %v1117_v7 = vld [vmem:[%s1499_s1 + $0x88] sm:$0xff]   ;;  %v1121_v11 = vld [vmem:[%s1499_s1 + $0x90] sm:$0xff]  }
   0x5   :  { %1014 = vmatpush3.bf16.msra.mxu1 %v1113_v3  ;;  %993 = vmatprep.subr.bf16.mxu0 %v1114_v4  ;;  %v1122_v12 = vld [vmem:[%s1499_s1 + $0x58] sm:$0xff]   ;;  %v1126_v16 = vld [vmem:[%s1499_s1 + $0x60] sm:$0xff]   ;;  %v1130_v20 = vld [vmem:[%s1499_s1 + $0x68] sm:$0xff]  }
   0x6   :  { %1015 = vmatprep.subr.bf16.mxu1 %v1115_v5  ;;  %v1123_v13 = vld [vmem:[%s1499_s1 + $0xd8] sm:$0xff]   ;;  %v1127_v17 = vld [vmem:[%s1499_s1 + $0xe0] sm:$0xff]   ;;  %v1131_v21 = vld [vmem:[%s1499_s1 + $0xe8] sm:$0xff]  }
   0x7   :  { %v1124_v14 = vld [vmem:[%s1499_s1 + $0x18] sm:$0xff]   ;;  %v1128_v18 = vld [vmem:[%s1499_s1 + $0x20] sm:$0xff]   ;;  %v1132_v22 = vld [vmem:[%s1499_s1 + $0x28] sm:$0xff]  }
   0x8   :  { %994 = vmatpush3.bf16.msra.mxu0 %v1116_v6  ;;  %v1125_v15 = vld [vmem:[%s1499_s1 + $0x98] sm:$0xff]   ;;  %v1129_v19 = vld [vmem:[%s1499_s1 + $0xa0] sm:$0xff]   ;;  %v1133_v23 = vld [vmem:[%s1499_s1 + $0xa8] sm:$0xff]  }
   0x9   :  { %1016 = vmatpush3.bf16.msra.mxu1 %v1117_v7  ;;  %995 = vmatprep.subr.bf16.mxu0 %v1118_v8  ;;  %v1134_v24 = vld [vmem:[%s1499_s1 + $0x70] sm:$0xff]   ;;  %v1138_v28 = vld [vmem:[%s1499_s1 + $0x78] sm:$0xff]   ;;  %v28_v32 = vld [vmem:[%s1498_s0] sm:$0xff] }
   0xa   :  { %1017 = vmatprep.subr.bf16.mxu1 %v1119_v9  ;;  %v1135_v25 = vld [vmem:[%s1499_s1 + $0xf0] sm:$0xff]   ;;  %v1139_v29 = vld [vmem:[%s1499_s1 + $0xf8] sm:$0xff]   ;;  %v29_v33 = vld [vmem:[%s1498_s0 + $0x8] sm:$0xff]  ;;  %v909_v34 = vcombine.low %v28_v32, %v28_v32  ;;  %v910_v35 = vcombine.high %v28_v32, %v28_v32 }
   0xb   :  { %v1136_v26 = vld [vmem:[%s1499_s1 + $0x30] sm:$0xff]   ;;  %v1140_v30 = vld [vmem:[%s1499_s1 + $0x38] sm:$0xff]   ;;  %v911_v36 = vcombine.low %v29_v33, %v29_v33  ;;  %v912_v37 = vcombine.high %v29_v33, %v29_v33  ;;  %v1146_v38 = vld [vmem:[%s1499_s1 + $0x140] sm:$0xff]  }
   0xc   :  { %996 = vmatpush3.bf16.msra.mxu0 %v1120_v10  ;;  %v1137_v27 = vld [vmem:[%s1499_s1 + $0xb0] sm:$0xff]   ;;  %v1141_v31 = vld [vmem:[%s1499_s1 + $0xb8] sm:$0xff]   ;;  %v1147_v39 = vld [vmem:[%s1499_s1 + $0x1c0] sm:$0xff]   ;;  %611 = vmatprep.mubr.bf16.mxu0 %v910_v35 }
   0xd   :  { %1018 = vmatpush3.bf16.msra.mxu1 %v1121_v11  ;;  %997 = vmatprep.subr.bf16.mxu0 %v1122_v12  ;;  %v1148_v40 = vld [vmem:[%s1499_s1 + $0x100] sm:$0xff]   ;;  %v1150_v42 = vld [vmem:[%s1499_s1 + $0x148] sm:$0xff]   ;;  %v1154_v46 = vld [vmem:[%s1499_s1 + $0x150] sm:$0xff]  }
   0xe   :  { %1019 = vmatprep.subr.bf16.mxu1 %v1123_v13  ;;  %651 = vmatprep.mubr.bf16.mxu1 %v912_v37  ;;  %v1149_v41 = vld [vmem:[%s1499_s1 + $0x180] sm:$0xff]   ;;  %v1151_v43 = vld [vmem:[%s1499_s1 + $0x1c8] sm:$0xff]   ;;  %v1155_v47 = vld [vmem:[%s1499_s1 + $0x1d0] sm:$0xff]  }
   0xf   :  { %v1152_v44 = vld [vmem:[%s1499_s1 + $0x108] sm:$0xff]   ;;  %v1156_v48 = vld [vmem:[%s1499_s1 + $0x110] sm:$0xff]   ;;  %v1158_v50 = vld [vmem:[%s1499_s1 + $0x158] sm:$0xff]  }
  0x10   :  { %998 = vmatpush3.bf16.msra.mxu0 %v1124_v14  ;;  %v1153_v45 = vld [vmem:[%s1499_s1 + $0x188] sm:$0xff]   ;;  %v1157_v49 = vld [vmem:[%s1499_s1 + $0x190] sm:$0xff]   ;;  %v1159_v51 = vld [vmem:[%s1499_s1 + $0x1d8] sm:$0xff]  }
  0x11   :  { %1020 = vmatpush3.bf16.msra.mxu1 %v1125_v15  ;;  %999 = vmatprep.subr.bf16.mxu0 %v1126_v16  ;;  %v1160_v52 = vld [vmem:[%s1499_s1 + $0x118] sm:$0xff]   ;;  %v1162_v54 = vld [vmem:[%s1499_s1 + $0x160] sm:$0xff]   ;;  %v1166_v58 = vld [vmem:[%s1499_s1 + $0x168] sm:$0xff]  }
  0x12   :  { %1021 = vmatprep.subr.bf16.mxu1 %v1127_v17  ;;  %v1161_v53 = vld [vmem:[%s1499_s1 + $0x198] sm:$0xff]   ;;  %v1163_v55 = vld [vmem:[%s1499_s1 + $0x1e0] sm:$0xff]   ;;  %v1167_v59 = vld [vmem:[%s1499_s1 + $0x1e8] sm:$0xff]  }
  0x13   :  { %v1164_v56 = vld [vmem:[%s1499_s1 + $0x120] sm:$0xff]   ;;  %v1168_v60 = vld [vmem:[%s1499_s1 + $0x128] sm:$0xff]   ;;  %v1170_v62 = vld [vmem:[%s1499_s1 + $0x170] sm:$0xff]  }
  0x14   :  { %1000 = vmatpush3.bf16.msra.mxu0 %v1128_v18  ;;  %v1165_v57 = vld [vmem:[%s1499_s1 + $0x1a0] sm:$0xff]   ;;  %v1169_v61 = vld [vmem:[%s1499_s1 + $0x1a8] sm:$0xff]   ;;  %v1171_v63 = vld [vmem:[%s1499_s1 + $0x1f0] sm:$0xff]  }
  0x15   :  { %1022 = vmatpush3.bf16.msra.mxu1 %v1129_v19  ;;  %1001 = vmatprep.subr.bf16.mxu0 %v1130_v20  ;;  %v1172_v0 = vld [vmem:[%s1499_s1 + $0x130] sm:$0xff]   ;;  %v1174_v2 = vld [vmem:[%s1499_s1 + $0x178] sm:$0xff]  }
  0x16   :  { %1023 = vmatprep.subr.bf16.mxu1 %v1131_v21  ;;  %v1173_v1 = vld [vmem:[%s1499_s1 + $0x1b0] sm:$0xff]   ;;  %v1175_v3 = vld [vmem:[%s1499_s1 + $0x1f8] sm:$0xff]  }
  0x17   :  { %v1176_v4 = vld [vmem:[%s1499_s1 + $0x138] sm:$0xff]   ;;  %v30_v6 = vld [vmem:[%s1498_s0 + $0x10] sm:$0xff] }
  0x18   :  { %1002 = vmatpush3.bf16.msra.mxu0 %v1132_v22  ;;  %v1177_v5 = vld [vmem:[%s1499_s1 + $0x1b8] sm:$0xff]   ;;  %v913_v7 = vcombine.low %v30_v6, %v30_v6  ;;  %v914_v8 = vcombine.high %v30_v6, %v30_v6 }
  0x19   :  { %1024 = vmatpush3.bf16.msra.mxu1 %v1133_v23  ;;  %1003 = vmatprep.subr.bf16.mxu0 %v1134_v24  ;;  %v31_v9 = vld [vmem:[%s1498_s0 + $0x18] sm:$0xff] }
  0x1a   :  { %1025 = vmatprep.subr.bf16.mxu1 %v1135_v25  ;;  %v915_v10 = vcombine.low %v31_v9, %v31_v9  ;;  %v916_v11 = vcombine.high %v31_v9, %v31_v9 }
  0x1c   :  { %1004 = vmatpush3.bf16.msra.mxu0 %v1136_v26 }
  0x1d   :  { %1026 = vmatpush3.bf16.msra.mxu1 %v1137_v27  ;;  %1005 = vmatprep.subr.bf16.mxu0 %v1138_v28 }
  0x1e   :  { %1027 = vmatprep.subr.bf16.mxu1 %v1139_v29 }
  0x20   :  { %1006 = vmatpush3.bf16.msra.mxu0 %v1140_v30 }
  0x21   :  { %1028 = vmatpush3.bf16.msra.mxu1 %v1141_v31  ;;  %1035 = vmatprep.subr.bf16.mxu0 %v1146_v38 }
  0x22   :  { %1057 = vmatprep.subr.bf16.mxu1 %v1147_v39 }
  0x23   :  { %612 = vmatmul.mubr.bf16.vlgmr.msra.gmra.mrb[0].mxu0 %v909_v34 }
  0x24   :  { %652 = vmatmul.mubr.bf16.vlgmr.msra.gmra.mrb[0].mxu1 %v911_v36  ;;  %1036 = vmatpush3.bf16.msra.mxu0 %v1148_v40 }
  0x25   :  { %1058 = vmatpush3.bf16.msra.mxu1 %v1149_v41  ;;  %1037 = vmatprep.subr.bf16.mxu0 %v1150_v42 }
  0x26   :  { %1059 = vmatprep.subr.bf16.mxu1 %v1151_v43  ;;  %691 = vmatprep.mubr.bf16.mxu0 %v914_v8 }
  0x27   :  { %731 = vmatprep.mubr.bf16.mxu1 %v916_v11 }
  0x28   :  { %1038 = vmatpush3.bf16.msra.mxu0 %v1152_v44 }
  0x29   :  { %1060 = vmatpush3.bf16.msra.mxu1 %v1153_v45  ;;  %1039 = vmatprep.subr.bf16.mxu0 %v1154_v46 }
  0x2a   :  { %1061 = vmatprep.subr.bf16.mxu1 %v1155_v47 }
  0x2c   :  { %1040 = vmatpush3.bf16.msra.mxu0 %v1156_v48 }
  0x2d   :  { %1062 = vmatpush3.bf16.msra.mxu1 %v1157_v49  ;;  %1041 = vmatprep.subr.bf16.mxu0 %v1158_v50 }
  0x2e   :  { %1063 = vmatprep.subr.bf16.mxu1 %v1159_v51 }
  0x30   :  { %1042 = vmatpush3.bf16.msra.mxu0 %v1160_v52 }
  0x31   :  { %1064 = vmatpush3.bf16.msra.mxu1 %v1161_v53  ;;  %1043 = vmatprep.subr.bf16.mxu0 %v1162_v54 }
  0x32   :  { %1065 = vmatprep.subr.bf16.mxu1 %v1163_v55 }
  0x34   :  { %1044 = vmatpush3.bf16.msra.mxu0 %v1164_v56 }
  0x35   :  { %1066 = vmatpush3.bf16.msra.mxu1 %v1165_v57  ;;  %1045 = vmatprep.subr.bf16.mxu0 %v1166_v58 }
  0x36   :  { %1067 = vmatprep.subr.bf16.mxu1 %v1167_v59 }
  0x38   :  { %1046 = vmatpush3.bf16.msra.mxu0 %v1168_v60 }
  0x39   :  { %1068 = vmatpush3.bf16.msra.mxu1 %v1169_v61  ;;  %1047 = vmatprep.subr.bf16.mxu0 %v1170_v62 }
  0x3a   :  { %1069 = vmatprep.subr.bf16.mxu1 %v1171_v63 }
  0x3c   :  { %1048 = vmatpush3.bf16.msra.mxu0 %v1172_v0 }
  0x3d   :  { %1070 = vmatpush3.bf16.msra.mxu1 %v1173_v1  ;;  %1049 = vmatprep.subr.bf16.mxu0 %v1174_v2 }
  0x3e   :  { %1071 = vmatprep.subr.bf16.mxu1 %v1175_v3 }
  0x40   :  { %1050 = vmatpush3.bf16.msra.mxu0 %v1176_v4 }
  0x41   :  { %1072 = vmatpush3.bf16.msra.mxu1 %v1177_v5 }
  0x43   :  { %692 = vmatmul.mubr.bf16.vlgmr.msra.gmra.mrb[4].mxu0 %v913_v7 }
  0x44   :  { %732 = vmatmul.mubr.bf16.vlgmr.msra.gmra.mrb[4].mxu1 %v915_v10 }
  0x45   :  { %12 = vsyncpa [#allocation3], 0  ;;  %v1182_v12 = vld [vmem:[%s1501_s3] sm:$0xff]   ;;  %v1212_v13 = vmov 0.0   ;;  %v1183_v14 = vld [vmem:[%s1501_s3 + $0x8] sm:$0xff]   ;;  %vm1213_vm0 = vmmov 0  }
  0x46   :  { %1087 = vmatprep.subr.bf16.mxu0 %v1212_v13  ;;  %1099 = vmatprep.subr.bf16.mxu1 %v1212_v13  ;;  %v1184_v15 = vld [vmem:[%s1501_s3 + $0x10] sm:$0xff]   ;;  %v1185_v16 = vld [vmem:[%s1501_s3 + $0x18] sm:$0xff]   ;;  %v1186_v17 = vld [vmem:[%s1503_s5] sm:$0xff]   ;;  %vm780_vm1 = vcmask 523264   ;;  %vm849_vm2 = vcmask 261120   ;;  %s1214_s13 = smov [#allocation2]  }
  0x47   :  { %1088 = vmatpush3.bf16.msra.mxu0 %v1182_v12  ;;  %1095 = vmatprep.mubr.msk.bf16.mxu0 %vm1213_vm0, %v1212_v13  ;;  %v908_v20 = vld [vmem:[%s1500_s2] ss:$0 sm:$0xff]  ;;  %v1187_v45 = vld [vmem:[%s1503_s5 + $0x8] sm:$0xff]   ;;  %s900_s5 = sshll.u32 %s1214_s13, 4  ;;  %s901_s5 = int_to_ptr.vmem [resolvable:$true] %s900_s5 }
  0x48   :  { %1089 = vmatprep.subr.bf16.mxu0 %v1212_v13  ;;  %1103 = vmatprep.mubr.msk.bf16.mxu1 %vm1213_vm0, %v1212_v13  ;;  %v981_v46 = vld [vmem:[%s1502_s4] ss:$0 sm:$0xff]  ;;  %s1188_s4 = scalar_lea.vmem %s901_s5, 128  ;;  %p1193_p1 = scmp.lt.s32.totalorder %s901_s5, %s901_s5 }
  0x49   :  { %1100 = vmatpush3.bf16.msra.mxu1 %v1186_v17  ;;  %v987_v54 = vld [vmem:[%s1504_s6] ss:$0 sm:$0xff]  ;;  %p1189_p0 = scmp.ne.s32.totalorder %s901_s5, %s1188_s4  ;;  %p1194_p2 = scmp.lt.s32.totalorder %s1188_s4, %s1188_s4 }
  0x4a   :  { %1101 = vmatprep.subr.bf16.mxu1 %v1212_v13 }
  0x4b   :  { %1090 = vmatpush3.bf16.msra.mxu0 %v1183_v14  ;;  %p1195_p3 = por %p1194_p2, %p1193_p1 }
  0x4c   :  { %1091 = vmatprep.subr.bf16.mxu0 %v1212_v13 }
  0x4d   :  { %1102 = vmatpush3.bf16.msra.mxu1 %v1187_v45  ;;  %p1196_p4 = pnand %p1195_p3, %p1189_p0 }
  0x4f   :  { %1092 = vmatpush3.bf16.msra.mxu0 %v1184_v15 }
  0x50   :  { %1093 = vmatprep.subr.bf16.mxu0 %v1212_v13 }
  0x53   :  { %1094 = vmatpush3.bf16.msra.mxu0 %v1185_v16 }
  0xf6   :  { %v1007_v18 = vpop.f32.mrb[0].mxu0 }
  0xf7   :  { %v1029_v19 = vpop.f32.mrb[0].mxu1  ;;  %v1008_v21 = vpop.f32.mrb[1].mxu0 }
  0xf8   :  { %v1030_v22 = vpop.f32.mrb[1].mxu1  ;;  %v1009_v23 = vadd.f32 %v1008_v21, %v1007_v18  ;;  %v1010_v25 = vpop.f32.mrb[2].mxu0 }
  0xf9   :  { %v1031_v24 = vadd.f32 %v1030_v22, %v1029_v19  ;;  %v1032_v26 = vpop.f32.mrb[2].mxu1  ;;  %v1011_v27 = vpop.f32.mrb[3].mxu0 }
  0xfa   :  { %v1033_v28 = vpop.f32.mrb[3].mxu1  ;;  %v614_v29 = vadd.f32 %v1009_v23, %v908_v20 }
  0xfc   :  { %v654_v30 = vadd.f32 %v1031_v24, %v614_v29 }
 0x116   :  { %v1051_v31 = vpop.f32.mrb[4].mxu0 }
 0x117   :  { %v1073_v32 = vpop.f32.mrb[4].mxu1  ;;  %v1052_v33 = vpop.f32.mrb[5].mxu0 }
 0x118   :  { %v1074_v34 = vpop.f32.mrb[5].mxu1  ;;  %v1053_v35 = vadd.f32 %v1052_v33, %v1051_v31  ;;  %v1054_v37 = vpop.f32.mrb[6].mxu0 }
 0x119   :  { %v1075_v36 = vadd.f32 %v1074_v34, %v1073_v32  ;;  %v1076_v38 = vpop.f32.mrb[6].mxu1  ;;  %v1055_v39 = vpop.f32.mrb[7].mxu0 }
 0x11a   :  { %v1077_v40 = vpop.f32.mrb[7].mxu1  ;;  %v694_v41 = vadd.f32 %v1053_v35, %v654_v30 }
 0x11c   :  { %v734_v42 = vadd.f32 %v1075_v36, %v694_v41 }
 0x11e   :  { %v739_v43 = vmax.f32 %v734_v42, 0.0 }
 0x120   :  { %v740_v44 = vpack.c.bf16 %v739_v43, %v739_v43 }
 0x122   :  { %1096 = vmatmul.mubr.msk.bf16.vlgmr.msra.gmra.mrb[8].mxu0 %vm780_vm1, %v740_v44 }
 0x1f5   :  { %v818_v47 = vpop.f32.mrb[8].mxu0 }
 0x1f6   :  { %v819_v48 = vadd.f32 %v981_v46, %v818_v47  ;;  %v1097_v49 = vpop.f32.mrb[9].mxu0 }
 0x1f7   :  { %v821_v50 = vpop.f32.mrb[10].mxu0 }
 0x1f8   :  { %v824_v51 = vmax.f32 %v819_v48, 0.0  ;;  %v1098_v52 = vpop.f32.mrb[11].mxu0 }
 0x1fa   :  { %v825_v53 = vpack.c.bf16 %v824_v51, %v824_v51 }
 0x1fc   :  { %1104 = vmatmul.mubr.msk.bf16.vlgmr.msra.gmra.mrb[8].mxu1 %vm849_vm2, %v825_v53 }
 0x2cf   :  { %v887_v55 = vpop.f32.mrb[8].mxu1 }
 0x2d0   :  { %v888_v56 = vadd.f32 %v987_v54, %v887_v55  ;;  %v1105_v57 = vpop.f32.mrb[9].mxu1 }
 0x2d1   :  { %v890_v58 = vpop.f32.mrb[10].mxu1 }
 0x2d2   :  { %893 = vst [vmem:[#allocation2] sm:$0xff] %v888_v56  ;;  %v1106_v59 = vpop.f32.mrb[11].mxu1 }
 0x2d3   :  { %1199 = shalt.err (!%p1196_p4)
}
 0x2d4   :  { %s1200_s6 = scalar_lea.hbm %s1505_s7, 128 }
 0x2d5   :  { %p1201_p5 = scmp.ne.s32.totalorder %s1505_s7, %s1200_s6  ;;  %p1204_p6 = scmp.lt.u32.totalorder %s1200_s6, %s1505_s7 }
 0x2d7   :  { %p1206_p7 = pnand %p1204_p6, %p1201_p5 }
 0x2d9   :  { %1209 = shalt.err (!%p1206_p7)
}
 0x2da   :  { %903 = dma.vmem_to_hbm [thread:$0]  %s901_s5, 128, %s1505_s7, [#allocation3]  }
 0x2db   :  { %1210 = dma.done.wait [#allocation3], 128  }
 0x2dc   :  { %1211 = vsyncadd [#allocation3], 4294967168 }
 0x2dd   :  { %907 = vsyncpa [#allocation3], 1 }

</bundles_post_ra>
